<compile_context>
chip_gen: v5e
topology: v5e:2x2
jax: 0.10.0
libtpu: 0.0.40
codegen_flags: <defaults>
</compile_context>

<pallas_src>
import jax
import jax.numpy as jnp
from jax import lax
from jax.experimental import pallas as pl
from jax.experimental.pallas import tpu as pltpu


def _gw_and_denom(g, wc_ref):
    """One MXU pass: row 0 = g @ (W*stddev), row 1 = g.sum(axis=1), lane-major."""
    # Cast the tiny (2, F) stationary operand to the streamed dtype so bf16
    # inputs stay bf16 on the MXU (no extra f32-emulation passes); the
    # accumulation is f32 via preferred_element_type.
    wc = wc_ref[...].astype(g.dtype)
    # Both operands contract their LAST (lane / F) axis -> no transpose of the
    # large (tile_b, F) tile; result is (2, tile_b) with batch on the lanes.
    r = lax.dot_general(wc, g, (((1,), (1,)), ((), ())),
                        preferred_element_type=jnp.float32)
    gw = r[0:1, :]                       # (1, tile_b)
    denom = r[1:2, :] + jnp.float32(1e-6)  # epsilon added in f32
    return gw, denom


def _mlp_kernel_mask(g_ref, m_ref, wc_ref, b_ref, out_ref):
    # g_ref  : (TB, F) VMEM  groups_full tile (native dtype)
    # m_ref  : (TB, A) VMEM  atom_mask tile   (native dtype)
    # wc_ref : (2, F)  VMEM  row 0 = weight * stddev, row 1 = ones (row-sum)
    # b_ref  : (1,)    SMEM  folded bias = bias * stddev + mean
    # out_ref: (1, TB) VMEM  lane-dense (batch-on-lanes) output tile
    g = g_ref[...]
    gw, denom = _gw_and_denom(g, wc_ref)

    # natoms = atom_mask.sum(axis=1), also produced lane-major via a tiny
    # (1, A) x (TB, A)^T matvec (lane-axis contraction, no relayout).
    m = m_ref[...]
    ones_a = jnp.ones((1, m.shape[1]), m.dtype)
    natoms = lax.dot_general(ones_a, m, (((1,), (1,)), ((), ())),
                             preferred_element_type=jnp.float32)  # (1, TB)

    # NOTE: for a partial trailing block the padded lanes divide stale VMEM;
    # those lanes are discarded on writeback, so this is functionally correct.
    out_ref[...] = gw * natoms / denom + b_ref[0]


def _mlp_kernel_natoms(g_ref, n_ref, wc_ref, b_ref, out_ref):
    # Same as above, but natoms arrives precomputed, already lane-major (1, TB).
    g = g_ref[...]
    gw, denom = _gw_and_denom(g, wc_ref)
    out_ref[...] = gw * n_ref[...] / denom + b_ref[0]


def mlp_forward(groups_full, atom_mask, weight, bias, stddev, mean,
                *, natoms=None, tile_b=None):
    """Pallas wrapper.

    groups_full [B, F], atom_mask [B, A] (or natoms [B]/[B,1]/[1,B]),
    weight [F, 1] or [F], scalar bias/stddev/mean  ->  [B, 1] prediction.
    """
    B, F = groups_full.shape
    f32 = jnp.float32
    g_item = jnp.dtype(groups_full.dtype).itemsize

    use_mask = natoms is None
    if use_mask:
        A = atom_mask.shape[1]
        m_item = jnp.dtype(atom_mask.dtype).itemsize
        bytes_per_row = F * g_item + A * m_item
    else:
        bytes_per_row = F * g_item + 4

    # --- batch-tile selection: size by bytes, not rows -----------------------
    if tile_b is None:
        # ~2 MiB of streamed input per grid step amortizes the ~0.35 us/step
        # pipeline overhead (small tiles sit at ~30% of HBM roofline, ~1 MiB+
        # tiles reach 85%+).
        target_step_bytes = 2 << 20
        tile_b = max(128, (target_step_bytes // bytes_per_row) // 128 * 128)
        # Keep >= 2 grid steps on large batches so the "parallel" axis can be
        # sharded across both v7x TensorCores.
        if B >= 256:
            tile_b = min(tile_b, max(128, (B // 2) // 128 * 128))
        if tile_b >= B:
            tile_b = B  # single full-array block (exempt from (8,128) rule)

    # --- scoped-VMEM budget from the actual double-buffer footprint ----------
    vmem_bytes = 2 * tile_b * F * g_item            # groups_full double buffer
    if use_mask:
        vmem_bytes += 2 * tile_b * A * m_item       # atom_mask double buffer
    else:
        vmem_bytes += 2 * tile_b * 4                # natoms double buffer
    vmem_bytes += 2 * (2 * F * 4)                   # resident (2, F) weights
    vmem_bytes += 2 * tile_b * 4                    # (1, tile_b) output block
    # Raise v5e's 16 MiB default when needed; stay under v7x's 64 MiB physical.
    vmem_limit_bytes = int(min(max(2 * vmem_bytes + (2 << 20), 16 << 20),
                               28 << 20))

    # --- fold the affine epilogue into the weights at trace time -------------
    w_scaled = (jnp.asarray(weight, f32).reshape(1, F)
                * jnp.asarray(stddev, f32))                       # (1, F)
    wc = jnp.concatenate([w_scaled, jnp.ones((1, F), f32)], axis=0)  # (2, F)
    b_fold = (jnp.asarray(bias, f32) * jnp.asarray(stddev, f32)
              + jnp.asarray(mean, f32)).reshape(1)                # (1,) SMEM

    # --- specs / kernel selection --------------------------------------------
    in_specs = [pl.BlockSpec((tile_b, F), lambda i: (i, 0))]
    if use_mask:
        kernel = _mlp_kernel_mask
        side_arg = atom_mask
        in_specs.append(pl.BlockSpec((tile_b, A), lambda i: (i, 0)))
        side_bytes = B * A * m_item
        side_flops = 2 * B * A
    else:
        kernel = _mlp_kernel_natoms
        side_arg = jnp.asarray(natoms, f32).reshape(1, B)  # lane-major
        in_specs.append(pl.BlockSpec((1, tile_b), lambda i: (0, i)))
        side_bytes = B * 4
        side_flops = 0
    in_specs += [
        pl.BlockSpec((2, F), lambda i: (0, 0)),   # weights stay resident
        pl.BlockSpec(memory_space=pltpu.MemorySpace.SMEM),
    ]

    cost = pl.CostEstimate(
        flops=2 * B * 2 * F + side_flops + 4 * B,
        transcendentals=0,
        bytes_accessed=B * F * g_item + side_bytes + B * 4 + 2 * F * 4,
    )

    out = pl.pallas_call(
        kernel,
        out_shape=jax.ShapeDtypeStruct((1, B), f32),
        grid_spec=pltpu.PrefetchScalarGridSpec(
            num_scalar_prefetch=0,
            grid=(pl.cdiv(B, tile_b),),
            in_specs=in_specs,
            out_specs=pl.BlockSpec((1, tile_b), lambda i: (0, i)),
        ),
        compiler_params=pltpu.CompilerParams(
            dimension_semantics=("parallel",),
            vmem_limit_bytes=vmem_limit_bytes),
        cost_estimate=cost,
    )(groups_full, side_arg, wc, b_fold)

    # Layout plumbing only: lane-dense (1, B) back to the module's (B, 1).
    return out.reshape(B, 1)


def _reference(groups_full, atom_mask, weight, bias, stddev, mean):
    feat = groups_full / (groups_full.sum(1, keepdims=True) + 1e-6) \
        * atom_mask.sum(1, keepdims=True)
    pred = feat @ weight.reshape(-1, 1) + bias
    return pred * stddev + mean


if __name__ == "__main__":
    key = jax.random.PRNGKey(0)
    k1, k2, k3 = jax.random.split(key, 3)

    # Small shapes consistent with the module: Dense(feature_dim=32, 1).
    B, F, A = 8, 32, 16  # batch, feature_dim, max atoms

    groups_full = jax.random.uniform(k1, (B, F), dtype=jnp.float32)
    atom_mask = (jax.random.uniform(k2, (B, A)) > 0.3).astype(jnp.float32)

    limit = (6.0 / (F + 1)) ** 0.5
    weight = jax.random.uniform(k3, (F, 1), minval=-limit, maxval=limit,
                                dtype=jnp.float32)
    bias = jnp.float32(0.0)
    stddev = jnp.float32(2.5)    # property standardization (e.g. energy_U0)
    mean = jnp.float32(-76.1)

    ref = _reference(groups_full, atom_mask, weight, bias, stddev, mean)

    # 1) Module-faithful path (reads the atom mask).
    out = mlp_forward(groups_full, atom_mask, weight, bias, stddev, mean)
    out = jax.block_until_ready(out)
    assert out.shape == (B, 1)
    assert jnp.allclose(out, ref, atol=1e-3, rtol=1e-4), (out, ref)

    # 2) Fast path: precomputed natoms, no mask read.
    natoms = atom_mask.sum(axis=1)
    out2 = mlp_forward(groups_full, None, weight, bias, stddev, mean,
                       natoms=natoms)
    out2 = jax.block_until_ready(out2)
    assert jnp.allclose(out2, ref, atol=1e-3, rtol=1e-4), (out2, ref)

    # 3) Larger batch to exercise byte-sized batch tiling (multi-step grid).
    B2 = 384
    g2 = jax.random.uniform(jax.random.PRNGKey(1), (B2, F), dtype=jnp.float32)
    m2 = (jax.random.uniform(jax.random.PRNGKey(2), (B2, A)) > 0.3
          ).astype(jnp.float32)
    out3 = mlp_forward(g2, m2, weight, bias, stddev, mean)
    out3 = jax.block_until_ready(out3)
    ref3 = _reference(g2, m2, weight, bias, stddev, mean)
    assert out3.shape == (B2, 1)
    assert jnp.allclose(out3, ref3, atol=1e-3, rtol=1e-4)

    print("KERNEL_OK")
</pallas_src>

<mosaic_0001>
module attributes {stable_mosaic.version = 11 : i64} {
  func.func @_mlp_kernel_mask(%arg0: i32, %arg1: memref<8x32xf32, #tpu.memory_space<vmem>>, %arg2: memref<8x16xf32, #tpu.memory_space<vmem>>, %arg3: memref<2x32xf32, #tpu.memory_space<vmem>>, %arg4: memref<1xf32, #tpu.memory_space<smem>>, %arg5: memref<1x8xf32, #tpu.memory_space<vmem>>) attributes {dimension_semantics = [#tpu.dimension_semantics<parallel>], iteration_bounds = array<i64: 1>, scalar_prefetch = 0 : i64, scratch_operands = 0 : i64, tpu.core_type = #tpu.core_type<tc>, window_params = [{transform_indices = @transform_0, window_bounds = array<i64: 8, 32>}, {transform_indices = @transform_1, window_bounds = array<i64: 8, 16>}, {pipeline_mode = #tpu.pipeline_mode<synchronous>, transform_indices = @transform_2, window_bounds = array<i64: 2, 32>}, {transform_indices = @transform_3, window_bounds = array<i64: 1>}, {transform_indices = @transform_4, window_bounds = array<i64: 1, 8>}]} {
    %c0 = arith.constant 0 : index
    %c0_0 = arith.constant 0 : index
    %0 = vector.load %arg1[%c0, %c0_0] : memref<8x32xf32, #tpu.memory_space<vmem>>, vector<8x32xf32>
    %c0_1 = arith.constant 0 : index
    %c0_2 = arith.constant 0 : index
    %1 = vector.load %arg3[%c0_1, %c0_2] : memref<2x32xf32, #tpu.memory_space<vmem>>, vector<2x32xf32>
    %cst = arith.constant dense<0.000000e+00> : vector<2x8xf32>
    %2 = tpu.matmul %1, %0, %cst {dimension_numbers = #tpu.dot_dimension_numbers<[1], [1], [0], [0], [0, 0, 1, 0], [], []>} : vector<2x32xf32>, vector<8x32xf32>, vector<2x8xf32> -> vector<2x8xf32>
    %3 = vector.extract_strided_slice %2 {offsets = [0, 0], sizes = [1, 8], strides = [1, 1]} : vector<2x8xf32> to vector<1x8xf32>
    %4 = vector.extract_strided_slice %2 {offsets = [1, 0], sizes = [1, 8], strides = [1, 1]} : vector<2x8xf32> to vector<1x8xf32>
    %cst_3 = arith.constant 9.99999997E-7 : f32
    %5 = vector.broadcast %cst_3 : f32 to vector<1x8xf32>
    %6 = arith.addf %4, %5 : vector<1x8xf32>
    %c0_4 = arith.constant 0 : index
    %c0_5 = arith.constant 0 : index
    %7 = vector.load %arg2[%c0_4, %c0_5] : memref<8x16xf32, #tpu.memory_space<vmem>>, vector<8x16xf32>
    %cst_6 = arith.constant 1.000000e+00 : f32
    %8 = vector.broadcast %cst_6 : f32 to vector<1x16xf32>
    %cst_7 = arith.constant dense<0.000000e+00> : vector<1x8xf32>
    %9 = tpu.matmul %8, %7, %cst_7 {dimension_numbers = #tpu.dot_dimension_numbers<[1], [1], [0], [0], [0, 0, 1, 0], [], []>} : vector<1x16xf32>, vector<8x16xf32>, vector<1x8xf32> -> vector<1x8xf32>
    %10 = arith.mulf %3, %9 : vector<1x8xf32>
    %11 = arith.divf %10, %6 : vector<1x8xf32>
    %c0_8 = arith.constant 0 : index
    %12 = memref.load %arg4[%c0_8] : memref<1xf32, #tpu.memory_space<smem>>
    %13 = vector.broadcast %12 : f32 to vector<1x8xf32>
    %14 = arith.addf %11, %13 : vector<1x8xf32>
    %c0_9 = arith.constant 0 : index
    %c0_10 = arith.constant 0 : index
    %15 = vector.load %arg5[%c0_9, %c0_10] : memref<1x8xf32, #tpu.memory_space<vmem>>, vector<1x8xf32>
    tpu.vector_store %arg5[%c0_9, %c0_10], %14 {strides = array<i32>} : memref<1x8xf32, #tpu.memory_space<vmem>>, vector<1x8xf32>,
    return
  }
  func.func @transform_0(%arg0: i32) -> (i32, i32) {
    %c0_i32 = arith.constant 0 : i32
    %c0_i32_0 = arith.constant 0 : i32
    return %arg0, %c0_i32 : i32, i32
  }
  func.func @transform_1(%arg0: i32) -> (i32, i32) {
    %c0_i32 = arith.constant 0 : i32
    %c0_i32_0 = arith.constant 0 : i32
    return %arg0, %c0_i32 : i32, i32
  }
  func.func @transform_2(%arg0: i32) -> (i32, i32) {
    %c0_i32 = arith.constant 0 : i32
    %c0_i32_0 = arith.constant 0 : i32
    %c0_i32_1 = arith.constant 0 : i32
    return %c0_i32, %c0_i32_0 : i32, i32
  }
  func.func @transform_3(%arg0: i32) -> i32 {
    %c0_i32 = arith.constant 0 : i32
    %c0_i32_0 = arith.constant 0 : i32
    return %c0_i32 : i32
  }
  func.func @transform_4(%arg0: i32) -> (i32, i32) {
    %c0_i32 = arith.constant 0 : i32
    %c0_i32_0 = arith.constant 0 : i32
    return %c0_i32, %arg0 : i32, i32
  }
}

</mosaic_0001>

<bundles_post_ra>
// kernel: tpu_custom_call.1
= control target key start
LH: loop header
LB: loop body
LE: loop exit
PB: predicated region body
PF: predicated region fallthrough
CT: control target
= control target key end

     0   :  { %10 = vsyncpa [#allocation4], 0  ;;  %s279_s0 = inlined_call_operand.hbm [shape: f32[8,32], index: 0, kind: input, shape index: {}]   ;;  %s280_s1 = inlined_call_operand.hbm [shape: f32[8,16], index: 1, kind: input, shape index: {}]   ;;  %s281_s2 = inlined_call_operand.vmem [shape: f32[2,32], index: 2, kind: input, shape index: {}]   ;;  %s282_s3 = inlined_call_operand.<no memory space> [shape: f32[1], index: 3, kind: input, shape index: {}]   ;;  %s283_s4 = inlined_call_operand.hbm [shape: f32[1,8], index: 4, kind: output, shape index: {}]  }
   0x1   :  { %11 = vsyncpa [#allocation7], 0 }
   0x2   :  { %12 = vsyncpa [#allocation5], 0  ;;  %s18_s17 = sshll.u32 %s279_s0, 4  ;;  %s235_s18 = smov [#allocation3]   ;;  %s19_s17 = int_to_ptr.hbm [resolvable:$true] %s18_s17 }
   0x3   :  { %s20_s19 = sshll.u32 %s235_s18, 4  ;;  %s29_s22 = sshll.u32 %s280_s1, 4  ;;  %s21_s19 = int_to_ptr.vmem [resolvable:$true] %s20_s19  ;;  %s30_s22 = int_to_ptr.hbm [resolvable:$true] %s29_s22 }
   0x4   :  { %23 = dma.hbm_to_vmem [thread:$0]  %s19_s17, 128, %s21_s19, [#allocation4]  }
   0x5   :  { %s236_s23 = smov [#allocation6]  }
   0x6   :  { %s31_s24 = sshll.u32 %s236_s23, 4  ;;  %s32_s24 = int_to_ptr.vmem [resolvable:$true] %s31_s24 }
   0x7   :  { %34 = dma.hbm_to_vmem [thread:$0]  %s30_s22, 128, %s32_s24, [#allocation7]  }
   0x8   :  { %229 = dma.done.wait [#allocation4], 128  }
   0x9   :  { %230 = vsyncadd [#allocation4], 4294967168 }
   0xa   :  { %231 = dma.done.wait [#allocation7], 128  }
   0xb   :  { %232 = vsyncadd [#allocation7], 4294967168  ;;  %vm49_vm0 = vcmask 261120   ;;  %vm78_vm1 = vcmask 130048   ;;  %v47_v0 = vld [vmem:[#allocation3] sm:$0xff]  ;;  %v77_v1 = vld [vmem:[#allocation6] sm:$0xff]  ;;  %v125_v19 = vstv %s282_s3 }
   0xc   :  { %147 = vmatpush.xpose.msk.msra.mxu0 %vm49_vm0, %v47_v0  ;;  %149 = vmatpush.xpose.msk.msra.mxu1 %vm78_vm1, %v77_v1  ;;  %v48_v2 = vld [vmem:[%s281_s2] sm:$0x3]  ;;  %v237_v3 = vmov 1.0   ;;  %s238_s26 = smov [#allocation8]   ;;  %s136_s30 = sshll.u32 %s283_s4, 4  ;;  %vm127_vm6 = vcmask 57344   ;;  %s137_s30 = int_to_ptr.hbm [resolvable:$true] %s136_s30 }
   0xd   :  { %s134_s27 = sshll.u32 %s238_s26, 4  ;;  %s135_s27 = int_to_ptr.vmem [resolvable:$true] %s134_s27 }
   0xf   :  { %148 = vmatmul.msk.f32.vlgmr.msra.gmra.mxu0 %vm49_vm0, %v48_v2  ;;  %150 = vmatmul.msk.f32.vlgmr.msra.gmra.mxu1 %vm78_vm1, %v237_v3 }
  0x8c   :  { %v73_v4 = vpop.f32.mrf.mxu0  ;;  %v102_v13 = vpop.f32.mrf.mxu1 }
  0x8d   :  { %v76_v5 = vadd.f32 1e-06, %v73_v4  ;;  %v105_v16 = vmul.f32 %v102_v13, %v73_v4 }
  0x8f   :  { %v107_v6 = vrot.slane %v76_v5, 1 }
  0x91   :  { %155 = vrcp.f32 %v107_v6  ;;  %v120_v10 = vand.u32 2147483648, %v107_v6  ;;  %v118_v12 = vand.u32 2147483647, %v107_v6  ;;  %vm114_vm3 = vweird.f32 %v107_v6 }
  0x93   :  { %v121_v15 = vor.u32 1.1754944e-38, %v120_v10  ;;  %vm119_vm5 = vcmp.eq.f32.partialorder %v118_v12, 8.507059e+37 }
  0x97   :  { %v156_v7 = vpop.eup %155 }
  0x98   :  { %v110_v8 = vmul.f32 %v156_v7, %v107_v6  ;;  %vm115_vm2 = vweird.f32 %v156_v7 }
  0x99   :  { %vm116_vm4 = vmor %vm114_vm3, %vm115_vm2 }
  0x9a   :  { %v111_v9 = vsub.f32 1.0, %v110_v8 }
  0x9c   :  { %v112_v11 = vmul.f32 %v156_v7, %v111_v9 }
  0x9e   :  { %v113_v14 = vadd.f32 %v156_v7, %v112_v11 }
  0xa0   :  { %v117_v17 = vsel %vm116_vm4, %v156_v7, %v113_v14 }
  0xa1   :  { %v122_v18 = vsel %vm119_vm5, %v121_v15, %v117_v17 }
  0xa2   :  { %v123_v20 = vmul.f32 %v122_v18, %v105_v16 }
  0xa4   :  { %v126_v21 = vadd.f32 %v125_v19, %v123_v20 }
  0xa6   :  { %128 = vst.msk [vmem:[#allocation8] sm:$0x1] %vm127_vm6, %v126_v21 }
  0xa7   :  { %139 = dma.vmem_to_hbm [thread:$0]  %s135_s27, 16, %s137_s30, [#allocation5]  }
  0xa8   :  { %233 = dma.done.wait [#allocation5], 16  }
  0xa9   :  { %234 = vsyncadd [#allocation5], 4294967280 }
  0xaa   :  { %144 = vsyncpa [#allocation4], 1 }
  0xab   :  { %145 = vsyncpa [#allocation7], 1 }
  0xac   :  { %146 = vsyncpa [#allocation5], 1 }

</bundles_post_ra>
